<compile_context>
chip_gen: v7x
topology: tpu7x:2x2x1
jax: 0.10.0
libtpu: 0.0.40
codegen_flags: <defaults>
</compile_context>

<pallas_src>
import jax
import jax.numpy as jnp
from jax.experimental import pallas as pl
from jax.experimental.pallas import tpu as pltpu


def _round_up(x, m):
    return ((x + m - 1) // m) * m


# ------------------------------ kernel ------------------------------------ #

def gcn_fused_kernel(alpha_ref, seq_ref, adj_ref, w_ref, bfc_ref, bias_ref,
                     o_ref, acc_ref):
    """One (i, k) grid step of out = PReLU(adj @ (seq @ W + b_fc) + bias)."""
    k = pl.program_id(1)

    @pl.when(k == 0)
    def _():
        acc_ref[...] = jnp.zeros_like(acc_ref)

    # Recompute the k-th tile of seq_fts with fp32 accumulation, then feed
    # the second matmul in the compute dtype (bf16 or f32), fp32 accumulate.
    fts = jnp.dot(seq_ref[...], w_ref[...],
                  preferred_element_type=jnp.float32) + bfc_ref[...]
    acc_ref[...] += jnp.dot(adj_ref[...], fts.astype(adj_ref.dtype),
                            preferred_element_type=jnp.float32)

    @pl.when(k == pl.num_programs(1) - 1)
    def _():
        out = acc_ref[...] + bias_ref[...]
        alpha = alpha_ref[0]
        out = jnp.where(out >= 0.0, out, alpha * out)
        o_ref[...] = out.astype(o_ref.dtype)


# ----------------------------- wrapper ------------------------------------ #

def gcn_forward(seq, adj, w, b_fc, bias, alpha, *, tm=256, tk=512,
                compute_dtype=jnp.float32):
    """Dense GCN forward. seq:(N,in_ft)  adj:(N,N)  w:(in_ft,out_ft)."""
    n, in_ft = seq.shape
    out_ft = w.shape[1]

    # Lane/sublane-friendly padded sizes and tile sizes (clamped for small N).
    in_ft_p = _round_up(in_ft, 128)
    out_ft_p = _round_up(out_ft, 128)
    n_128 = _round_up(n, 128)
    tm = int(min(tm, n_128))
    tk = int(min(tk, n_128))
    n_rows = _round_up(n, tm)   # padded row dim of adj / out
    n_red = _round_up(n, tk)    # padded contraction (node) dim

    def pad2(x, r, c):
        pr, pc = r - x.shape[0], c - x.shape[1]
        return x if (pr == 0 and pc == 0) else jnp.pad(x, ((0, pr), (0, pc)))

    # Zero padding is exact: padded adj columns are 0, so padded seq_fts rows
    # (which equal b_fc) contribute nothing; padded out rows/cols are sliced off.
    seq_p = pad2(seq, n_red, in_ft_p).astype(compute_dtype)
    adj_p = pad2(adj, n_rows, n_red).astype(compute_dtype)
    w_p = pad2(w, in_ft_p, out_ft_p).astype(compute_dtype)
    bfc_p = pad2(b_fc.reshape(1, out_ft), 1, out_ft_p).astype(jnp.float32)
    bias_p = pad2(bias.reshape(1, out_ft), 1, out_ft_p).astype(jnp.float32)
    alpha_p = jnp.asarray(alpha, jnp.float32).reshape(1)

    grid = (n_rows // tm, n_red // tk)

    # VMEM budget: double-buffered inputs/output + fp32 accumulator + slack.
    cbytes = jnp.dtype(compute_dtype).itemsize
    vmem_est = (2 * (tm * tk + tk * in_ft_p + in_ft_p * out_ft_p
                     + 2 * out_ft_p) * cbytes
                + 3 * tm * out_ft_p * 4)
    vmem_limit = int(min(2 * vmem_est + (2 << 20), 64 * 1024 * 1024))

    out = pl.pallas_call(
        gcn_fused_kernel,
        out_shape=jax.ShapeDtypeStruct((n_rows, out_ft_p), jnp.float32),
        grid_spec=pltpu.PrefetchScalarGridSpec(
            num_scalar_prefetch=1,                      # alpha -> SMEM scalar
            grid=grid,
            in_specs=[
                pl.BlockSpec((tk, in_ft_p), lambda i, k, a: (k, 0)),        # seq
                pl.BlockSpec((tm, tk), lambda i, k, a: (i, k)),             # adj
                pl.BlockSpec((in_ft_p, out_ft_p), lambda i, k, a: (0, 0)),  # W
                pl.BlockSpec((1, out_ft_p), lambda i, k, a: (0, 0)),        # b_fc
                pl.BlockSpec((1, out_ft_p), lambda i, k, a: (0, 0)),        # bias
            ],
            out_specs=pl.BlockSpec((tm, out_ft_p), lambda i, k, a: (i, 0)),
            scratch_shapes=[pltpu.VMEM((tm, out_ft_p), jnp.float32)],
        ),
        compiler_params=pltpu.CompilerParams(
            dimension_semantics=("parallel", "arbitrary"),
            vmem_limit_bytes=vmem_limit),
    )(alpha_p, seq_p, adj_p, w_p, bfc_p, bias_p)

    return out[:n, :out_ft]


# --------------------------- reference (pure JAX) -------------------------- #

def gcn_reference(seq, adj, w, b_fc, bias, alpha):
    seq_fts = seq @ w + b_fc
    out = adj @ seq_fts + bias
    return jnp.where(out >= 0.0, out, alpha * out)


# ------------------------------- main -------------------------------------- #

if __name__ == "__main__":
    key = jax.random.PRNGKey(0)
    k_seq, k_adj, k_w, k_s2, k_a2 = jax.random.split(key, 5)

    # Small shapes consistent with the module (N nodes, in_ft -> out_ft).
    N, IN_FT, OUT_FT = 256, 128, 128
    seq = jax.random.normal(k_seq, (N, IN_FT), dtype=jnp.float32)
    adj = jax.random.uniform(k_adj, (N, N), dtype=jnp.float32)
    adj = adj / jnp.sum(adj, axis=1, keepdims=True)   # row-normalized adjacency

    # Deterministic parameter init matching the module's __init__:
    #  fc weight xavier_uniform, fc bias 0, gcn bias 0, PReLU alpha 0.25.
    bound = (6.0 / (IN_FT + OUT_FT)) ** 0.5
    w = jax.random.uniform(k_w, (IN_FT, OUT_FT), dtype=jnp.float32,
                           minval=-bound, maxval=bound)
    b_fc = jnp.zeros((OUT_FT,), dtype=jnp.float32)
    bias = jnp.zeros((OUT_FT,), dtype=jnp.float32)
    alpha = jnp.array(0.25, dtype=jnp.float32)

    ref = gcn_reference(seq, adj, w, b_fc, bias, alpha)

    # (a) default tiles -> single fused grid step for this small graph (fp32)
    out = jax.block_until_ready(gcn_forward(seq, adj, w, b_fc, bias, alpha))
    assert out.shape == (N, OUT_FT)
    assert jnp.allclose(out, ref, atol=1e-4, rtol=1e-4), "fp32 fused mismatch"

    # (b) multi-tile grid -> exercises the K-reduction accumulator path (fp32)
    out_t = jax.block_until_ready(
        gcn_forward(seq, adj, w, b_fc, bias, alpha, tm=128, tk=128))
    assert jnp.allclose(out_t, ref, atol=5e-4, rtol=1e-3), "tiled fp32 mismatch"

    # (c) bf16 matmuls with fp32 accumulation (perf path for v6e/v7x)
    out_bf = jax.block_until_ready(
        gcn_forward(seq, adj, w, b_fc, bias, alpha, compute_dtype=jnp.bfloat16))
    assert jnp.allclose(out_bf, ref, atol=2e-2, rtol=5e-2), "bf16 mismatch"

    # (d) ragged shapes + nonzero biases -> zero-padding path
    N2, IN2, OUT2 = 200, 96, 160
    seq2 = jax.random.normal(k_s2, (N2, IN2), dtype=jnp.float32)
    adj2 = jax.random.uniform(k_a2, (N2, N2), dtype=jnp.float32)
    adj2 = adj2 / jnp.sum(adj2, axis=1, keepdims=True)
    w2 = jax.random.normal(k_w, (IN2, OUT2), dtype=jnp.float32) * 0.1
    bfc2 = jnp.full((OUT2,), 0.3, dtype=jnp.float32)
    bias2 = jnp.full((OUT2,), -0.2, dtype=jnp.float32)
    out2 = jax.block_until_ready(gcn_forward(seq2, adj2, w2, bfc2, bias2, alpha))
    ref2 = gcn_reference(seq2, adj2, w2, bfc2, bias2, alpha)
    assert out2.shape == (N2, OUT2)
    assert jnp.allclose(out2, ref2, atol=5e-4, rtol=1e-3), "padded mismatch"

    # TODO(synk): sparse=True path (torch.spmm) is not implemented; the dense
    # adjacency matmul covers the sparse=False forward exactly.
    print("KERNEL_OK")
</pallas_src>

<mosaic_0001>
module attributes {stable_mosaic.version = 11 : i64} {
  func.func @gcn_fused_kernel(%arg0: i32, %arg1: i32, %arg2: memref<1xf32, #tpu.memory_space<smem>>, %arg3: memref<256x128xf32, #tpu.memory_space<vmem>>, %arg4: memref<256x256xf32, #tpu.memory_space<vmem>>, %arg5: memref<128x128xf32, #tpu.memory_space<vmem>>, %arg6: memref<1x128xf32, #tpu.memory_space<vmem>>, %arg7: memref<1x128xf32, #tpu.memory_space<vmem>>, %arg8: memref<256x128xf32, #tpu.memory_space<vmem>>, %arg9: memref<256x128xf32, #tpu.memory_space<vmem>>) attributes {dimension_semantics = [#tpu.dimension_semantics<parallel>, #tpu.dimension_semantics<arbitrary>], iteration_bounds = array<i64: 1, 1>, scalar_prefetch = 1 : i64, scratch_operands = 1 : i64, tpu.core_type = #tpu.core_type<tc>, window_params = [{transform_indices = @transform_0, window_bounds = array<i64: 256, 128>}, {transform_indices = @transform_1, window_bounds = array<i64: 256, 256>}, {pipeline_mode = #tpu.pipeline_mode<synchronous>, transform_indices = @transform_2, window_bounds = array<i64: 128, 128>}, {pipeline_mode = #tpu.pipeline_mode<synchronous>, transform_indices = @transform_3, window_bounds = array<i64: 1, 128>}, {pipeline_mode = #tpu.pipeline_mode<synchronous>, transform_indices = @transform_4, window_bounds = array<i64: 1, 128>}, {transform_indices = @transform_5, window_bounds = array<i64: 256, 128>}]} {
    %c0_i32 = arith.constant 0 : i32
    %0 = arith.cmpi eq, %arg1, %c0_i32 : i32
    %1 = arith.extui %0 : i1 to i32
    %c0_i32_0 = arith.constant 0 : i32
    %2 = arith.cmpi ne, %1, %c0_i32_0 : i32
    scf.if %2 {
      %cst_15 = arith.constant 0.000000e+00 : f32
      %17 = vector.broadcast %cst_15 : f32 to vector<256x128xf32>
      %c0_16 = arith.constant 0 : index
      %c0_17 = arith.constant 0 : index
      %18 = vector.load %arg9[%c0_16, %c0_17] : memref<256x128xf32, #tpu.memory_space<vmem>>, vector<256x128xf32>
      tpu.vector_store %arg9[%c0_16, %c0_17], %17 {strides = array<i32>} : memref<256x128xf32, #tpu.memory_space<vmem>>, vector<256x128xf32>,
    } else {
    }
    %c0 = arith.constant 0 : index
    %c0_1 = arith.constant 0 : index
    %3 = vector.load %arg3[%c0, %c0_1] : memref<256x128xf32, #tpu.memory_space<vmem>>, vector<256x128xf32>
    %c0_2 = arith.constant 0 : index
    %c0_3 = arith.constant 0 : index
    %4 = vector.load %arg5[%c0_2, %c0_3] : memref<128x128xf32, #tpu.memory_space<vmem>>, vector<128x128xf32>
    %cst = arith.constant dense<0.000000e+00> : vector<256x128xf32>
    %5 = tpu.matmul %3, %4, %cst {dimension_numbers = #tpu.dot_dimension_numbers<[1], [0], [0], [1], [0, 0, 1, 1], [], []>} : vector<256x128xf32>, vector<128x128xf32>, vector<256x128xf32> -> vector<256x128xf32>
    %c0_4 = arith.constant 0 : index
    %c0_5 = arith.constant 0 : index
    %6 = vector.load %arg6[%c0_4, %c0_5] : memref<1x128xf32, #tpu.memory_space<vmem>>, vector<1x128xf32>
    %7 = vector.broadcast %6 : vector<1x128xf32> to vector<256x128xf32>
    %8 = arith.addf %5, %7 : vector<256x128xf32>
    %c0_6 = arith.constant 0 : index
    %c0_7 = arith.constant 0 : index
    %9 = vector.load %arg9[%c0_6, %c0_7] : memref<256x128xf32, #tpu.memory_space<vmem>>, vector<256x128xf32>
    %c0_8 = arith.constant 0 : index
    %c0_9 = arith.constant 0 : index
    %10 = vector.load %arg4[%c0_8, %c0_9] : memref<256x256xf32, #tpu.memory_space<vmem>>, vector<256x256xf32>
    %cst_10 = arith.constant dense<0.000000e+00> : vector<256x128xf32>
    %11 = tpu.matmul %10, %8, %cst_10 {dimension_numbers = #tpu.dot_dimension_numbers<[1], [0], [0], [1], [0, 0, 1, 1], [], []>} : vector<256x256xf32>, vector<256x128xf32>, vector<256x128xf32> -> vector<256x128xf32>
    %12 = arith.addf %9, %11 : vector<256x128xf32>
    %c0_11 = arith.constant 0 : index
    %c0_12 = arith.constant 0 : index
    %13 = vector.load %arg9[%c0_11, %c0_12] : memref<256x128xf32, #tpu.memory_space<vmem>>, vector<256x128xf32>
    tpu.vector_store %arg9[%c0_11, %c0_12], %12 {strides = array<i32>} : memref<256x128xf32, #tpu.memory_space<vmem>>, vector<256x128xf32>,
    %c0_i32_13 = arith.constant 0 : i32
    %14 = arith.cmpi eq, %arg1, %c0_i32_13 : i32
    %15 = arith.extui %14 : i1 to i32
    %c0_i32_14 = arith.constant 0 : i32
    %16 = arith.cmpi ne, %15, %c0_i32_14 : i32
    scf.if %16 {
      %c0_15 = arith.constant 0 : index
      %c0_16 = arith.constant 0 : index
      %17 = vector.load %arg9[%c0_15, %c0_16] : memref<256x128xf32, #tpu.memory_space<vmem>>, vector<256x128xf32>
      %c0_17 = arith.constant 0 : index
      %c0_18 = arith.constant 0 : index
      %18 = vector.load %arg7[%c0_17, %c0_18] : memref<1x128xf32, #tpu.memory_space<vmem>>, vector<1x128xf32>
      %19 = vector.broadcast %18 : vector<1x128xf32> to vector<256x128xf32>
      %20 = arith.addf %17, %19 : vector<256x128xf32>
      %c0_19 = arith.constant 0 : index
      %21 = memref.load %arg2[%c0_19] : memref<1xf32, #tpu.memory_space<smem>>
      %cst_20 = arith.constant 0.000000e+00 : f32
      %22 = vector.broadcast %cst_20 : f32 to vector<256x128xf32>
      %23 = arith.cmpf oge, %20, %22 : vector<256x128xf32>
      %24 = vector.broadcast %21 : f32 to vector<256x128xf32>
      %25 = arith.mulf %24, %20 : vector<256x128xf32>
      %26 = arith.select %23, %20, %25 : vector<256x128xi1>, vector<256x128xf32>
      %c0_21 = arith.constant 0 : index
      %c0_22 = arith.constant 0 : index
      %27 = vector.load %arg8[%c0_21, %c0_22] : memref<256x128xf32, #tpu.memory_space<vmem>>, vector<256x128xf32>
      tpu.vector_store %arg8[%c0_21, %c0_22], %26 {strides = array<i32>} : memref<256x128xf32, #tpu.memory_space<vmem>>, vector<256x128xf32>,
    } else {
    }
    return
  }
  func.func @transform_0(%arg0: i32, %arg1: i32, %arg2: memref<1xf32, #tpu.memory_space<smem>>) -> (i32, i32) {
    %c0_i32 = arith.constant 0 : i32
    %c0_i32_0 = arith.constant 0 : i32
    return %arg1, %c0_i32 : i32, i32
  }
  func.func @transform_1(%arg0: i32, %arg1: i32, %arg2: memref<1xf32, #tpu.memory_space<smem>>) -> (i32, i32) {
    %c0_i32 = arith.constant 0 : i32
    return %arg0, %arg1 : i32, i32
  }
  func.func @transform_2(%arg0: i32, %arg1: i32, %arg2: memref<1xf32, #tpu.memory_space<smem>>) -> (i32, i32) {
    %c0_i32 = arith.constant 0 : i32
    %c0_i32_0 = arith.constant 0 : i32
    %c0_i32_1 = arith.constant 0 : i32
    return %c0_i32, %c0_i32_0 : i32, i32
  }
  func.func @transform_3(%arg0: i32, %arg1: i32, %arg2: memref<1xf32, #tpu.memory_space<smem>>) -> (i32, i32) {
    %c0_i32 = arith.constant 0 : i32
    %c0_i32_0 = arith.constant 0 : i32
    %c0_i32_1 = arith.constant 0 : i32
    return %c0_i32, %c0_i32_0 : i32, i32
  }
  func.func @transform_4(%arg0: i32, %arg1: i32, %arg2: memref<1xf32, #tpu.memory_space<smem>>) -> (i32, i32) {
    %c0_i32 = arith.constant 0 : i32
    %c0_i32_0 = arith.constant 0 : i32
    %c0_i32_1 = arith.constant 0 : i32
    return %c0_i32, %c0_i32_0 : i32, i32
  }
  func.func @transform_5(%arg0: i32, %arg1: i32, %arg2: memref<1xf32, #tpu.memory_space<smem>>) -> (i32, i32) {
    %c0_i32 = arith.constant 0 : i32
    %c0_i32_0 = arith.constant 0 : i32
    return %arg0, %c0_i32 : i32, i32
  }
}

</mosaic_0001>

<bundles_post_ra>
// kernel: tpu_custom_call.1
= control target key start
LH: loop header
LB: loop body
LE: loop exit
PB: predicated region body
PF: predicated region fallthrough
CT: control target
= control target key end

     0   :  { %12 = vsyncpa [#allocation6], 0  ;;  %s1576_s0 = inlined_call_operand.<no memory space> [shape: f32[1], index: 0, kind: input, shape index: {}]   ;;  %s1577_s1 = inlined_call_operand.hbm [shape: f32[256,128], index: 1, kind: input, shape index: {}]   ;;  %s1578_s2 = inlined_call_operand.hbm [shape: f32[256,256], index: 2, kind: input, shape index: {}]   ;;  %s1579_s3 = inlined_call_operand.hbm [shape: f32[128,128], index: 3, kind: input, shape index: {}]   ;;  %s1580_s4 = inlined_call_operand.vmem [shape: f32[1,128], index: 4, kind: input, shape index: {}]   ;;  %s1581_s5 = inlined_call_operand.vmem [shape: f32[1,128], index: 5, kind: input, shape index: {}]   ;;  %s1582_s6 = inlined_call_operand.hbm [shape: f32[256,128], index: 6, kind: output, shape index: {}]  }
   0x1   :  { %13 = vsyncpa [#allocation9], 0 }
   0x2   :  { %14 = vsyncpa [#allocation7], 0  ;;  %s1332_s21 = smov [#allocation8]   ;;  %s1238_s25 = scalar_lea.hbm %s1578_s2, 8192 }
   0x3   :  { %s32_s22 = sshll.u32 %s1332_s21, 4  ;;  %p1239_p0 = scmp.ne.s32.totalorder %s1578_s2, %s1238_s25  ;;  %s33_s22 = int_to_ptr.vmem [resolvable:$true] %s32_s22 }
   0x4   :  { %p1242_p1 = scmp.lt.u32.totalorder %s1238_s25, %s1578_s2 }
   0x6   :  { %p1244_p2 = pnand %p1242_p1, %p1239_p0 }
   0x8   :  { %1247 = shalt.err (!%p1244_p2)
}
   0x9   :  { %s1248_s30 = scalar_lea.vmem %s33_s22, 8192  ;;  %p1253_p4 = scmp.lt.s32.totalorder %s33_s22, %s33_s22 }
   0xa   :  { %p1249_p3 = scmp.ne.s32.totalorder %s33_s22, %s1248_s30  ;;  %p1254_p5 = scmp.lt.s32.totalorder %s1248_s30, %s1248_s30 }
   0xc   :  { %p1255_p6 = por %p1254_p5, %p1253_p4 }
   0xe   :  { %p1256_p7 = pnand %p1255_p6, %p1249_p3 }
  0x10   :  { %1259 = shalt.err (!%p1256_p7)
}
  0x11   :  { %s1333_s7 = smov 256   ;;  %s1334_s8 = smov 16  }
  0x12   :  { %38 = dma.hbm_to_vmem [thread:$0]  %s1578_s2, 8192, %s33_s22, [#allocation9], %s1333_s7, %s1333_s7, %s1334_s8  }
  0x13   :  { %s1335_s11 = smov [#allocation5]   ;;  %s1260_s15 = scalar_lea.hbm %s1577_s1, 4096 }
  0x14   :  { %s20_s12 = sshll.u32 %s1335_s11, 4  ;;  %p1261_p8 = scmp.ne.s32.totalorder %s1577_s1, %s1260_s15  ;;  %s21_s12 = int_to_ptr.vmem [resolvable:$true] %s20_s12 }
  0x15   :  { %p1264_p9 = scmp.lt.u32.totalorder %s1260_s15, %s1577_s1 }
  0x17   :  { %p1266_p10 = pnand %p1264_p9, %p1261_p8 }
  0x19   :  { %1269 = shalt.err (!%p1266_p10)
}
  0x1a   :  { %s1270_s20 = scalar_lea.vmem %s21_s12, 4096  ;;  %p1275_p12 = scmp.lt.s32.totalorder %s21_s12, %s21_s12 }
  0x1b   :  { %p1271_p11 = scmp.ne.s32.totalorder %s21_s12, %s1270_s20  ;;  %p1276_p13 = scmp.lt.s32.totalorder %s1270_s20, %s1270_s20 }
  0x1d   :  { %p1277_p0 = por %p1276_p13, %p1275_p12 }
  0x1f   :  { %p1278_p1 = pnand %p1277_p0, %p1271_p11 }
  0x21   :  { %1281 = shalt.err (!%p1278_p1)
}
  0x22   :  { %s1336_s2 = smov 128   ;;  %s1337_s21 = smov 8  }
  0x23   :  { %26 = dma.hbm_to_vmem [thread:$0]  %s1577_s1, 4096, %s21_s12, [#allocation6], %s1336_s2, %s1336_s2, %s1337_s21  }
  0x24   :  { %s1338_s24 = smov [#allocation10]   ;;  %s1282_s28 = scalar_lea.hbm %s1579_s3, 2048 }
  0x25   :  { %s44_s25 = sshll.u32 %s1338_s24, 4  ;;  %p1283_p2 = scmp.ne.s32.totalorder %s1579_s3, %s1282_s28  ;;  %s45_s25 = int_to_ptr.vmem [resolvable:$true] %s44_s25 }
  0x26   :  { %p1286_p3 = scmp.lt.u32.totalorder %s1282_s28, %s1579_s3 }
  0x28   :  { %p1288_p4 = pnand %p1286_p3, %p1283_p2 }
  0x2a   :  { %1291 = shalt.err (!%p1288_p4)
}
  0x2b   :  { %s1292_s9 = scalar_lea.vmem %s45_s25, 2048  ;;  %p1297_p6 = scmp.lt.s32.totalorder %s45_s25, %s45_s25 }
  0x2c   :  { %p1293_p5 = scmp.ne.s32.totalorder %s45_s25, %s1292_s9  ;;  %p1298_p7 = scmp.lt.s32.totalorder %s1292_s9, %s1292_s9 }
  0x2e   :  { %p1299_p8 = por %p1298_p7, %p1297_p6 }
  0x30   :  { %p1300_p9 = pnand %p1299_p8, %p1293_p5 }
  0x32   :  { %1303 = shalt.err (!%p1300_p9)
}
  0x33   :  { %50 = dma.hbm_to_vmem [thread:$0]  %s1579_s3, 2048, %s45_s25, [#allocation9], %s1336_s2, %s1336_s2, %s1337_s21  }
  0x34   :  { %1326 = dma.done.wait [#allocation6], 4096  }
  0x35   :  { %1327 = vsyncadd [#allocation6], 4294963200 }
  0x36   :  { %1328 = dma.done.wait [#allocation9], 10240  }
  0x37   :  { %1329 = vsyncadd [#allocation9], 4294957056  ;;  %v132_v0 = vld [vmem:[#allocation10] sm:$0xff]  ;;  %v133_v1 = vld [vmem:[#allocation10 + $0x8] sm:$0xff]  ;;  %v1339_v56 = vmov 0.0|0.0  }
  0x38   :  { %v134_v2 = vld [vmem:[#allocation10 + $0x10] sm:$0xff]  ;;  %v1117_v3 = vpack.c.bf16 %v133_v1, %v132_v0  ;;  %v135_v4 = vld [vmem:[#allocation10 + $0x18] sm:$0xff]  ;;  %v136_v6 = vld [vmem:[#allocation10 + $0x20] sm:$0xff]  ;;  %1197 = vmatprep.subr.bf16.mxu1 %v1339_v56 }
  0x39   :  { %v1121_v5 = vpack.c.bf16 %v135_v4, %v134_v2  ;;  %v137_v7 = vld [vmem:[#allocation10 + $0x28] sm:$0xff]  ;;  %v100_v9 = vld [vmem:[#allocation5] sm:$0xff]  ;;  %v138_v10 = vld [vmem:[#allocation10 + $0x30] sm:$0xff] }
  0x3a   :  { %1118 = vmatprep.subr.bf16.mxu0 %v1117_v3  ;;  %v1125_v8 = vpack.c.bf16 %v137_v7, %v136_v6  ;;  %v139_v11 = vld [vmem:[#allocation10 + $0x38] sm:$0xff]  ;;  %1069 = vmatprep.mubr.f32.mxu0 %v100_v9  ;;  %v140_v13 = vld [vmem:[#allocation10 + $0x40] sm:$0xff]  ;;  %v141_v14 = vld [vmem:[#allocation10 + $0x48] sm:$0xff] }
  0x3b   :  { %1120 = vmatpush3.bf16.msra.mxu0 %v1117_v3  ;;  %v1129_v12 = vpack.c.bf16 %v139_v11, %v138_v10  ;;  %v1133_v15 = vpack.c.bf16 %v141_v14, %v140_v13  ;;  %v142_v16 = vld [vmem:[#allocation10 + $0x50] sm:$0xff]  ;;  %v143_v17 = vld [vmem:[#allocation10 + $0x58] sm:$0xff]  ;;  %v144_v19 = vld [vmem:[#allocation10 + $0x60] sm:$0xff] }
  0x3c   :  { %1122 = vmatprep.subr.bf16.mxu0 %v1121_v5  ;;  %v1137_v18 = vpack.c.bf16 %v143_v17, %v142_v16  ;;  %v145_v20 = vld [vmem:[#allocation10 + $0x68] sm:$0xff]  ;;  %v146_v22 = vld [vmem:[#allocation10 + $0x70] sm:$0xff]  ;;  %v147_v23 = vld [vmem:[#allocation10 + $0x78] sm:$0xff] }
  0x3d   :  { %v1141_v21 = vpack.c.bf16 %v145_v20, %v144_v19  ;;  %v1145_v24 = vpack.c.bf16 %v147_v23, %v146_v22  ;;  %v101_v25 = vld [vmem:[#allocation5 + $0x8] sm:$0xff]  ;;  %v102_v26 = vld [vmem:[#allocation5 + $0x10] sm:$0xff]  ;;  %v103_v27 = vld [vmem:[#allocation5 + $0x18] sm:$0xff] }
  0x3e   :  { %v104_v28 = vld [vmem:[#allocation5 + $0x20] sm:$0xff]  ;;  %v105_v29 = vld [vmem:[#allocation5 + $0x28] sm:$0xff]  ;;  %v106_v30 = vld [vmem:[#allocation5 + $0x30] sm:$0xff] }
  0x3f   :  { %1124 = vmatpush3.bf16.msra.mxu0 %v1121_v5  ;;  %v107_v31 = vld [vmem:[#allocation5 + $0x38] sm:$0xff]  ;;  %v108_v32 = vld [vmem:[#allocation5 + $0x40] sm:$0xff]  ;;  %v109_v33 = vld [vmem:[#allocation5 + $0x48] sm:$0xff] }
  0x40   :  { %1126 = vmatprep.subr.bf16.mxu0 %v1125_v8  ;;  %v110_v34 = vld [vmem:[#allocation5 + $0x50] sm:$0xff]  ;;  %v111_v35 = vld [vmem:[#allocation5 + $0x58] sm:$0xff]  ;;  %v112_v36 = vld [vmem:[#allocation5 + $0x60] sm:$0xff] }
  0x41   :  { %v113_v37 = vld [vmem:[#allocation5 + $0x68] sm:$0xff]  ;;  %v114_v38 = vld [vmem:[#allocation5 + $0x70] sm:$0xff]  ;;  %v115_v39 = vld [vmem:[#allocation5 + $0x78] sm:$0xff] }
  0x42   :  { %v116_v40 = vld [vmem:[#allocation5 + $0x80] sm:$0xff]  ;;  %v117_v41 = vld [vmem:[#allocation5 + $0x88] sm:$0xff]  ;;  %v118_v42 = vld [vmem:[#allocation5 + $0x90] sm:$0xff] }
  0x43   :  { %1128 = vmatpush3.bf16.msra.mxu0 %v1125_v8  ;;  %v119_v43 = vld [vmem:[#allocation5 + $0x98] sm:$0xff]  ;;  %v120_v44 = vld [vmem:[#allocation5 + $0xa0] sm:$0xff]  ;;  %v121_v45 = vld [vmem:[#allocation5 + $0xa8] sm:$0xff] }
  0x44   :  { %1130 = vmatprep.subr.bf16.mxu0 %v1129_v12  ;;  %v122_v46 = vld [vmem:[#allocation5 + $0xb0] sm:$0xff]  ;;  %v123_v47 = vld [vmem:[#allocation5 + $0xb8] sm:$0xff]  ;;  %v124_v48 = vld [vmem:[#allocation5 + $0xc0] sm:$0xff] }
  0x45   :  { %v125_v49 = vld [vmem:[#allocation5 + $0xc8] sm:$0xff]  ;;  %v126_v50 = vld [vmem:[#allocation5 + $0xd0] sm:$0xff]  ;;  %v127_v51 = vld [vmem:[#allocation5 + $0xd8] sm:$0xff] }
  0x46   :  { %v128_v52 = vld [vmem:[#allocation5 + $0xe0] sm:$0xff]  ;;  %v129_v53 = vld [vmem:[#allocation5 + $0xe8] sm:$0xff]  ;;  %v130_v54 = vld [vmem:[#allocation5 + $0xf0] sm:$0xff] }
  0x47   :  { %1132 = vmatpush3.bf16.msra.mxu0 %v1129_v12  ;;  %v131_v55 = vld [vmem:[#allocation5 + $0xf8] sm:$0xff]  ;;  %v437_v57 = vld [vmem:[#allocation8 + $0xc8] sm:$0xff]  ;;  %v1423_v59 = vld [vmem:[%s1580_s4] ss:$0 sm:$0xff] }
  0x48   :  { %1134 = vmatprep.subr.bf16.mxu0 %v1133_v15  ;;  %600 = vmatprep.mubr.f32.mxu1 %v437_v57  ;;  %v413_v58 = vld [vmem:[#allocation8 + $0x8] sm:$0xff] }
  0x4b   :  { %1136 = vmatpush3.bf16.msra.mxu0 %v1133_v15 }
  0x4c   :  { %1138 = vmatprep.subr.bf16.mxu0 %v1137_v18 }
  0x4f   :  { %1140 = vmatpush3.bf16.msra.mxu0 %v1137_v18 }
  0x50   :  { %1142 = vmatprep.subr.bf16.mxu0 %v1141_v21 }
  0x53   :  { %1144 = vmatpush3.bf16.msra.mxu0 %v1141_v21 }
  0x54   :  { %1146 = vmatprep.subr.bf16.mxu0 %v1145_v24 }
  0x57   :  { %1148 = vmatpush3.bf16.msra.mxu0 %v1145_v24 }
  0x58   :  { %1149 = vmatprep.subr.bf16.mxu0 %v1339_v56 }
  0x5a   :  { %1070 = vmatmul.mubr.f32.vlgmr.msra.gmra.mrb[0].mxu0 %v101_v25 }
  0x5b   :  { %1072 = vmatprep.mubr.f32.mxu0 %v102_v26 }
  0x5e   :  { %1073 = vmatmul.mubr.f32.gmra.mrb[2].mxu0 %v103_v27 }
  0x5f   :  { %1075 = vmatprep.mubr.f32.mxu0 %v104_v28 }
  0x62   :  { %1076 = vmatmul.mubr.f32.gmra.mrb[4].mxu0 %v105_v29 }
  0x63   :  { %1078 = vmatprep.mubr.f32.mxu0 %v106_v30 }
  0x66   :  { %1079 = vmatmul.mubr.f32.gmra.mrb[6].mxu0 %v107_v31 }
  0x67   :  { %1081 = vmatprep.mubr.f32.mxu0 %v108_v32 }
  0x6a   :  { %1082 = vmatmul.mubr.f32.gmra.mrb[8].mxu0 %v109_v33 }
  0x6b   :  { %1084 = vmatprep.mubr.f32.mxu0 %v110_v34 }
  0x6e   :  { %1085 = vmatmul.mubr.f32.gmra.mrb[10].mxu0 %v111_v35 }
  0x6f   :  { %1087 = vmatprep.mubr.f32.mxu0 %v112_v36 }
  0x72   :  { %1088 = vmatmul.mubr.f32.gmra.mrb[12].mxu0 %v113_v37 }
  0x73   :  { %1090 = vmatprep.mubr.f32.mxu0 %v114_v38 }
  0x76   :  { %1091 = vmatmul.mubr.f32.gmra.mrb[14].mxu0 %v115_v39 }
  0x77   :  { %1093 = vmatprep.mubr.f32.mxu0 %v116_v40 }
  0x7a   :  { %1094 = vmatmul.mubr.f32.gmra.mrb[16].mxu0 %v117_v41 }
  0x7b   :  { %1096 = vmatprep.mubr.f32.mxu0 %v118_v42 }
  0x7e   :  { %1097 = vmatmul.mubr.f32.gmra.mrb[18].mxu0 %v119_v43 }
  0x7f   :  { %1099 = vmatprep.mubr.f32.mxu0 %v120_v44 }
  0x82   :  { %1100 = vmatmul.mubr.f32.gmra.mrb[20].mxu0 %v121_v45 }
  0x83   :  { %1102 = vmatprep.mubr.f32.mxu0 %v122_v46 }
  0x86   :  { %1103 = vmatmul.mubr.f32.gmra.mrb[22].mxu0 %v123_v47 }
  0x87   :  { %1105 = vmatprep.mubr.f32.mxu0 %v124_v48 }
  0x8a   :  { %1106 = vmatmul.mubr.f32.gmra.mrb[24].mxu0 %v125_v49 }
  0x8b   :  { %1108 = vmatprep.mubr.f32.mxu0 %v126_v50 }
  0x8e   :  { %1109 = vmatmul.mubr.f32.gmra.mrb[26].mxu0 %v127_v51 }
  0x8f   :  { %1111 = vmatprep.mubr.f32.mxu0 %v128_v52 }
  0x92   :  { %1112 = vmatmul.mubr.f32.gmra.mrb[28].mxu0 %v129_v53 }
  0x93   :  { %1114 = vmatprep.mubr.f32.mxu0 %v130_v54 }
  0x96   :  { %1115 = vmatmul.mubr.f32.gmra.mrb[30].mxu0 %v131_v55 }
  0x97   :  { %540 = vmatprep.mubr.f32.mxu0 %v413_v58 }
 0x12d   :  { %v1071_v60 = vpop.f32.mrb[0].mxu0 }
 0x12e   :  { %v227_v61 = vadd.f32 %v1071_v60, %v1423_v59  ;;  %v221_v62 = vpop.f32.mrb[1].mxu0 }
 0x12f   :  { %v222_v63 = vadd.f32 %v1423_v59, %v221_v62 }
 0x131   :  { %v1150_v0 = vpack.c.bf16 %v227_v61, %v222_v63  ;;  %v1074_v1 = vpop.f32.mrb[2].mxu0 }
 0x132   :  { %v237_v2 = vadd.f32 %v1074_v1, %v1423_v59  ;;  %v231_v3 = vpop.f32.mrb[3].mxu0 }
 0x133   :  { %v232_v4 = vadd.f32 %v1423_v59, %v231_v3  ;;  %1151 = vmatpush1.bf16.msra.mxu0 %v1150_v0  ;;  %1213 = vmatpush1.bf16.msra.mxu1 %v1150_v0 }
 0x134   :  { %1152 = vmatprep.subr.bf16.mxu0 %v1339_v56  ;;  %1198 = vmatprep.subr.bf16.mxu1 %v1339_v56 }
 0x135   :  { %v1153_v5 = vpack.c.bf16 %v237_v2, %v232_v4  ;;  %v1077_v6 = vpop.f32.mrb[4].mxu0 }
 0x136   :  { %v247_v7 = vadd.f32 %v1077_v6, %v1423_v59  ;;  %v241_v8 = vpop.f32.mrb[5].mxu0 }
 0x137   :  { %v242_v9 = vadd.f32 %v1423_v59, %v241_v8  ;;  %1154 = vmatpush1.bf16.msra.mxu0 %v1153_v5  ;;  %1214 = vmatpush1.bf16.msra.mxu1 %v1153_v5 }
 0x138   :  { %1155 = vmatprep.subr.bf16.mxu0 %v1339_v56  ;;  %1199 = vmatprep.subr.bf16.mxu1 %v1339_v56 }
 0x139   :  { %v1156_v10 = vpack.c.bf16 %v247_v7, %v242_v9  ;;  %v1080_v11 = vpop.f32.mrb[6].mxu0 }
 0x13a   :  { %v257_v12 = vadd.f32 %v1080_v11, %v1423_v59  ;;  %v251_v13 = vpop.f32.mrb[7].mxu0 }
 0x13b   :  { %v252_v14 = vadd.f32 %v1423_v59, %v251_v13  ;;  %1157 = vmatpush1.bf16.msra.mxu0 %v1156_v10  ;;  %1215 = vmatpush1.bf16.msra.mxu1 %v1156_v10 }
 0x13c   :  { %1158 = vmatprep.subr.bf16.mxu0 %v1339_v56  ;;  %1200 = vmatprep.subr.bf16.mxu1 %v1339_v56 }
 0x13d   :  { %v1159_v15 = vpack.c.bf16 %v257_v12, %v252_v14  ;;  %v1083_v16 = vpop.f32.mrb[8].mxu0  ;;  %v436_v14 = vld [vmem:[#allocation8 + $0xc0] sm:$0xff] }
 0x13e   :  { %v267_v17 = vadd.f32 %v1083_v16, %v1423_v59  ;;  %v261_v18 = vpop.f32.mrb[9].mxu0  ;;  %v439_v16 = vld [vmem:[#allocation8 + $0xd8] sm:$0xff] }
 0x13f   :  { %v262_v19 = vadd.f32 %v1423_v59, %v261_v18  ;;  %1160 = vmatpush1.bf16.msra.mxu0 %v1159_v15  ;;  %1216 = vmatpush1.bf16.msra.mxu1 %v1159_v15  ;;  %v412_v15 = vld [vmem:[#allocation8] sm:$0xff]  ;;  %v438_v18 = vld [vmem:[#allocation8 + $0xd0] sm:$0xff] }
 0x140   :  { %1161 = vmatprep.subr.bf16.mxu0 %v1339_v56  ;;  %1201 = vmatprep.subr.bf16.mxu1 %v1339_v56 }
 0x141   :  { %v1162_v20 = vpack.c.bf16 %v267_v17, %v262_v19  ;;  %v1086_v21 = vpop.f32.mrb[10].mxu0  ;;  %v415_v17 = vld [vmem:[#allocation8 + $0x18] sm:$0xff]  ;;  %v414_v19 = vld [vmem:[#allocation8 + $0x10] sm:$0xff] }
 0x142   :  { %v277_v22 = vadd.f32 %v1086_v21, %v1423_v59  ;;  %v271_v23 = vpop.f32.mrb[11].mxu0  ;;  %v440_v21 = vld [vmem:[#allocation8 + $0xe0] sm:$0xff] }
 0x143   :  { %v272_v24 = vadd.f32 %v1423_v59, %v271_v23  ;;  %1163 = vmatpush1.bf16.msra.mxu0 %v1162_v20  ;;  %1217 = vmatpush1.bf16.msra.mxu1 %v1162_v20  ;;  %v417_v20 = vld [vmem:[#allocation8 + $0x28] sm:$0xff]  ;;  %v419_v23 = vld [vmem:[#allocation8 + $0x38] sm:$0xff] }
 0x144   :  { %1164 = vmatprep.subr.bf16.mxu0 %v1339_v56  ;;  %1202 = vmatprep.subr.bf16.mxu1 %v1339_v56 }
 0x145   :  { %v1165_v25 = vpack.c.bf16 %v277_v22, %v272_v24  ;;  %v1089_v26 = vpop.f32.mrb[12].mxu0  ;;  %v443_v22 = vld [vmem:[#allocation8 + $0xf8] sm:$0xff]  ;;  %v442_v24 = vld [vmem:[#allocation8 + $0xf0] sm:$0xff] }
 0x146   :  { %v287_v27 = vadd.f32 %v1089_v26, %v1423_v59  ;;  %v281_v28 = vpop.f32.mrb[13].mxu0  ;;  %v445_v26 = vld [vmem:[#allocation8 + $0x108] sm:$0xff] }
 0x147   :  { %v282_v29 = vadd.f32 %v1423_v59, %v281_v28  ;;  %1166 = vmatpush1.bf16.msra.mxu0 %v1165_v25  ;;  %1218 = vmatpush1.bf16.msra.mxu1 %v1165_v25  ;;  %v418_v25 = vld [vmem:[#allocation8 + $0x30] sm:$0xff]  ;;  %v444_v28 = vld [vmem:[#allocation8 + $0x100] sm:$0xff] }
 0x148   :  { %1167 = vmatprep.subr.bf16.mxu0 %v1339_v56  ;;  %1203 = vmatprep.subr.bf16.mxu1 %v1339_v56 }
 0x149   :  { %v1168_v30 = vpack.c.bf16 %v287_v27, %v282_v29  ;;  %v1092_v31 = vpop.f32.mrb[14].mxu0  ;;  %v421_v27 = vld [vmem:[#allocation8 + $0x48] sm:$0xff]  ;;  %v420_v29 = vld [vmem:[#allocation8 + $0x40] sm:$0xff] }
 0x14a   :  { %v297_v32 = vadd.f32 %v1092_v31, %v1423_v59  ;;  %v291_v33 = vpop.f32.mrb[15].mxu0  ;;  %v423_v31 = vld [vmem:[#allocation8 + $0x58] sm:$0xff] }
 0x14b   :  { %v292_v34 = vadd.f32 %v1423_v59, %v291_v33  ;;  %1169 = vmatpush1.bf16.msra.mxu0 %v1168_v30  ;;  %1219 = vmatpush1.bf16.msra.mxu1 %v1168_v30  ;;  %v447_v30 = vld [vmem:[#allocation8 + $0x118] sm:$0xff]  ;;  %v422_v33 = vld [vmem:[#allocation8 + $0x50] sm:$0xff] }
 0x14c   :  { %1170 = vmatprep.subr.bf16.mxu0 %v1339_v56  ;;  %1204 = vmatprep.subr.bf16.mxu1 %v1339_v56 }
 0x14d   :  { %v1171_v35 = vpack.c.bf16 %v297_v32, %v292_v34  ;;  %v1095_v36 = vpop.f32.mrb[16].mxu0  ;;  %v446_v32 = vld [vmem:[#allocation8 + $0x110] sm:$0xff]  ;;  %v449_v34 = vld [vmem:[#allocation8 + $0x128] sm:$0xff] }
 0x14e   :  { %v307_v37 = vadd.f32 %v1095_v36, %v1423_v59  ;;  %v301_v38 = vpop.f32.mrb[17].mxu0  ;;  %v448_v36 = vld [vmem:[#allocation8 + $0x120] sm:$0xff] }
 0x14f   :  { %v302_v39 = vadd.f32 %v1423_v59, %v301_v38  ;;  %1172 = vmatpush1.bf16.msra.mxu0 %v1171_v35  ;;  %1220 = vmatpush1.bf16.msra.mxu1 %v1171_v35  ;;  %v425_v35 = vld [vmem:[#allocation8 + $0x68] sm:$0xff]  ;;  %v451_v38 = vld [vmem:[#allocation8 + $0x138] sm:$0xff] }
 0x150   :  { %1173 = vmatprep.subr.bf16.mxu0 %v1339_v56  ;;  %1205 = vmatprep.subr.bf16.mxu1 %v1339_v56 }
 0x151   :  { %v1174_v40 = vpack.c.bf16 %v307_v37, %v302_v39  ;;  %v1098_v41 = vpop.f32.mrb[18].mxu0  ;;  %v424_v37 = vld [vmem:[#allocation8 + $0x60] sm:$0xff]  ;;  %v427_v39 = vld [vmem:[#allocation8 + $0x78] sm:$0xff] }
 0x152   :  { %v317_v42 = vadd.f32 %v1098_v41, %v1423_v59  ;;  %v311_v43 = vpop.f32.mrb[19].mxu0  ;;  %v426_v41 = vld [vmem:[#allocation8 + $0x70] sm:$0xff] }
 0x153   :  { %v312_v44 = vadd.f32 %v1423_v59, %v311_v43  ;;  %1175 = vmatpush1.bf16.msra.mxu0 %v1174_v40  ;;  %1221 = vmatpush1.bf16.msra.mxu1 %v1174_v40  ;;  %v450_v40 = vld [vmem:[#allocation8 + $0x130] sm:$0xff]  ;;  %v429_v43 = vld [vmem:[#allocation8 + $0x88] sm:$0xff] }
 0x154   :  { %1176 = vmatprep.subr.bf16.mxu0 %v1339_v56  ;;  %1206 = vmatprep.subr.bf16.mxu1 %v1339_v56 }
 0x155   :  { %v1177_v45 = vpack.c.bf16 %v317_v42, %v312_v44  ;;  %v1101_v46 = vpop.f32.mrb[20].mxu0  ;;  %v453_v42 = vld [vmem:[#allocation8 + $0x148] sm:$0xff]  ;;  %v452_v44 = vld [vmem:[#allocation8 + $0x140] sm:$0xff] }
 0x156   :  { %v327_v47 = vadd.f32 %v1101_v46, %v1423_v59  ;;  %v321_v48 = vpop.f32.mrb[21].mxu0  ;;  %v455_v46 = vld [vmem:[#allocation8 + $0x158] sm:$0xff] }
 0x157   :  { %v322_v49 = vadd.f32 %v1423_v59, %v321_v48  ;;  %1178 = vmatpush1.bf16.msra.mxu0 %v1177_v45  ;;  %1222 = vmatpush1.bf16.msra.mxu1 %v1177_v45  ;;  %v428_v45 = vld [vmem:[#allocation8 + $0x80] sm:$0xff]  ;;  %v454_v48 = vld [vmem:[#allocation8 + $0x150] sm:$0xff] }
 0x158   :  { %1179 = vmatprep.subr.bf16.mxu0 %v1339_v56  ;;  %1207 = vmatprep.subr.bf16.mxu1 %v1339_v56 }
 0x159   :  { %v1180_v50 = vpack.c.bf16 %v327_v47, %v322_v49  ;;  %v1104_v51 = vpop.f32.mrb[22].mxu0  ;;  %v431_v47 = vld [vmem:[#allocation8 + $0x98] sm:$0xff]  ;;  %v430_v49 = vld [vmem:[#allocation8 + $0x90] sm:$0xff] }
 0x15a   :  { %v337_v52 = vadd.f32 %v1104_v51, %v1423_v59  ;;  %v331_v53 = vpop.f32.mrb[23].mxu0  ;;  %v433_v51 = vld [vmem:[#allocation8 + $0xa8] sm:$0xff] }
 0x15b   :  { %v332_v54 = vadd.f32 %v1423_v59, %v331_v53  ;;  %1181 = vmatpush1.bf16.msra.mxu0 %v1180_v50  ;;  %1223 = vmatpush1.bf16.msra.mxu1 %v1180_v50  ;;  %v457_v50 = vld [vmem:[#allocation8 + $0x168] sm:$0xff]  ;;  %v432_v53 = vld [vmem:[#allocation8 + $0xa0] sm:$0xff] }
 0x15c   :  { %1182 = vmatprep.subr.bf16.mxu0 %v1339_v56  ;;  %1208 = vmatprep.subr.bf16.mxu1 %v1339_v56 }
 0x15d   :  { %v1183_v55 = vpack.c.bf16 %v337_v52, %v332_v54  ;;  %v1107_v57 = vpop.f32.mrb[24].mxu0  ;;  %v456_v52 = vld [vmem:[#allocation8 + $0x160] sm:$0xff]  ;;  %v459_v54 = vld [vmem:[#allocation8 + $0x178] sm:$0xff] }
 0x15e   :  { %v347_v58 = vadd.f32 %v1107_v57, %v1423_v59  ;;  %v341_v60 = vpop.f32.mrb[25].mxu0  ;;  %v458_v57 = vld [vmem:[#allocation8 + $0x170] sm:$0xff] }
 0x15f   :  { %v342_v61 = vadd.f32 %v1423_v59, %v341_v60  ;;  %1184 = vmatpush1.bf16.msra.mxu0 %v1183_v55  ;;  %1224 = vmatpush1.bf16.msra.mxu1 %v1183_v55  ;;  %v435_v55 = vld [vmem:[#allocation8 + $0xb8] sm:$0xff]  ;;  %v461_v60 = vld [vmem:[#allocation8 + $0x188] sm:$0xff] }
 0x160   :  { %1185 = vmatprep.subr.bf16.mxu0 %v1339_v56  ;;  %1209 = vmatprep.subr.bf16.mxu1 %v1339_v56 }
 0x161   :  { %v1186_v62 = vpack.c.bf16 %v347_v58, %v342_v61  ;;  %v1110_v63 = vpop.f32.mrb[26].mxu0  ;;  %v434_v58 = vld [vmem:[#allocation8 + $0xb0] sm:$0xff]  ;;  %v460_v61 = vld [vmem:[#allocation8 + $0x180] sm:$0xff] }
 0x162   :  { %v357_v0 = vadd.f32 %v1110_v63, %v1423_v59  ;;  %v351_v1 = vpop.f32.mrb[27].mxu0  ;;  %v462_v63 = vld [vmem:[#allocation8 + $0x190] sm:$0xff] }
 0x163   :  { %v352_v2 = vadd.f32 %v1423_v59, %v351_v1  ;;  %1187 = vmatpush1.bf16.msra.mxu0 %v1186_v62  ;;  %1225 = vmatpush1.bf16.msra.mxu1 %v1186_v62  ;;  %v463_v62 = vld [vmem:[#allocation8 + $0x198] sm:$0xff]  ;;  %v464_v1 = vld [vmem:[#allocation8 + $0x1a0] sm:$0xff] }
 0x164   :  { %1188 = vmatprep.subr.bf16.mxu0 %v1339_v56  ;;  %1210 = vmatprep.subr.bf16.mxu1 %v1339_v56 }
 0x165   :  { %v1189_v3 = vpack.c.bf16 %v357_v0, %v352_v2  ;;  %v1113_v4 = vpop.f32.mrb[28].mxu0  ;;  %v465_v0 = vld [vmem:[#allocation8 + $0x1a8] sm:$0xff]  ;;  %v467_v2 = vld [vmem:[#allocation8 + $0x1b8] sm:$0xff] }
 0x166   :  { %v367_v5 = vadd.f32 %v1113_v4, %v1423_v59  ;;  %v361_v6 = vpop.f32.mrb[29].mxu0  ;;  %v469_v4 = vld [vmem:[#allocation8 + $0x1c8] sm:$0xff] }
 0x167   :  { %v362_v7 = vadd.f32 %v1423_v59, %v361_v6  ;;  %1190 = vmatpush1.bf16.msra.mxu0 %v1189_v3  ;;  %1226 = vmatpush1.bf16.msra.mxu1 %v1189_v3  ;;  %v466_v3 = vld [vmem:[#allocation8 + $0x1b0] sm:$0xff]  ;;  %v471_v6 = vld [vmem:[#allocation8 + $0x1d8] sm:$0xff] }
 0x168   :  { %1191 = vmatprep.subr.bf16.mxu0 %v1339_v56  ;;  %1211 = vmatprep.subr.bf16.mxu1 %v1339_v56 }
 0x169   :  { %v1192_v8 = vpack.c.bf16 %v367_v5, %v362_v7  ;;  %v1116_v9 = vpop.f32.mrb[30].mxu0  ;;  %v468_v5 = vld [vmem:[#allocation8 + $0x1c0] sm:$0xff]  ;;  %v470_v7 = vld [vmem:[#allocation8 + $0x1d0] sm:$0xff] }
 0x16a   :  { %v377_v10 = vadd.f32 %v1116_v9, %v1423_v59  ;;  %v371_v11 = vpop.f32.mrb[31].mxu0  ;;  %v472_v9 = vld [vmem:[#allocation8 + $0x1e0] sm:$0xff] }
 0x16b   :  { %v372_v12 = vadd.f32 %v1423_v59, %v371_v11  ;;  %1193 = vmatpush1.bf16.msra.mxu0 %v1192_v8  ;;  %1227 = vmatpush1.bf16.msra.mxu1 %v1192_v8  ;;  %v441_v59 = vld [vmem:[#allocation8 + $0xe8] sm:$0xff]  ;;  %v474_v11 = vld [vmem:[#allocation8 + $0x1f0] sm:$0xff] }
 0x16c   :  { %1194 = vmatprep.subr.bf16.mxu0 %v1339_v56  ;;  %1212 = vmatprep.subr.bf16.mxu1 %v1339_v56  ;;  %v416_v56 = vld [vmem:[#allocation8 + $0x20] sm:$0xff]  ;;  %v473_v8 = vld [vmem:[#allocation8 + $0x1e8] sm:$0xff] }
 0x16d   :  { %v1195_v13 = vpack.c.bf16 %v377_v10, %v372_v12  ;;  %v475_v10 = vld [vmem:[#allocation8 + $0x1f8] sm:$0xff]  ;;  %v1490_v12 = vld [vmem:[%s1581_s5] ss:$0 sm:$0xff] }
 0x16f   :  { %1196 = vmatpush1.bf16.msra.mxu0 %v1195_v13  ;;  %1228 = vmatpush1.bf16.msra.mxu1 %v1195_v13 }
 0x172   :  { %601 = vmatmul.mubr.f32.vlgmr.msra.gmra.mrb[0].mxu1 %v436_v14  ;;  %541 = vmatmul.mubr.f32.vlgmr.msra.gmra.mrb[32].mxu0 %v412_v15  ;;  %v1495_v14 = vstv %s1576_s0  ;;  %s1340_s0 = smov [#allocation11]  }
 0x173   :  { %605 = vmatprep.mubr.f32.mxu1 %v439_v16  ;;  %545 = vmatprep.mubr.f32.mxu0 %v415_v17  ;;  %s974_s5 = sshll.u32 %s1340_s0, 4  ;;  %s975_s5 = int_to_ptr.vmem [resolvable:$true] %s974_s5 }
 0x174   :  { %s1304_s15 = scalar_lea.vmem %s975_s5, 4096  ;;  %p1309_p11 = scmp.lt.s32.totalorder %s975_s5, %s975_s5 }
 0x175   :  { %p1305_p10 = scmp.ne.s32.totalorder %s975_s5, %s1304_s15  ;;  %p1310_p12 = scmp.lt.s32.totalorder %s1304_s15, %s1304_s15 }
 0x176   :  { %606 = vmatmul.mubr.f32.gmra.mrb[2].mxu1 %v438_v18  ;;  %546 = vmatmul.mubr.f32.gmra.mrb[34].mxu0 %v414_v19 }
 0x177   :  { %610 = vmatprep.mubr.f32.mxu1 %v441_v59  ;;  %550 = vmatprep.mubr.f32.mxu0 %v417_v20  ;;  %p1311_p13 = por %p1310_p12, %p1309_p11 }
 0x179   :  { %p1312_p0 = pnand %p1311_p13, %p1305_p10 }
 0x17a   :  { %611 = vmatmul.mubr.f32.gmra.mrb[4].mxu1 %v440_v21  ;;  %551 = vmatmul.mubr.f32.gmra.mrb[36].mxu0 %v416_v56 }
 0x17b   :  { %615 = vmatprep.mubr.f32.mxu1 %v443_v22  ;;  %555 = vmatprep.mubr.f32.mxu0 %v419_v23 }
 0x17e   :  { %616 = vmatmul.mubr.f32.gmra.mrb[6].mxu1 %v442_v24  ;;  %556 = vmatmul.mubr.f32.gmra.mrb[38].mxu0 %v418_v25 }
 0x17f   :  { %620 = vmatprep.mubr.f32.mxu1 %v445_v26  ;;  %560 = vmatprep.mubr.f32.mxu0 %v421_v27 }
 0x182   :  { %621 = vmatmul.mubr.f32.gmra.mrb[8].mxu1 %v444_v28  ;;  %561 = vmatmul.mubr.f32.gmra.mrb[40].mxu0 %v420_v29 }
 0x183   :  { %625 = vmatprep.mubr.f32.mxu1 %v447_v30  ;;  %565 = vmatprep.mubr.f32.mxu0 %v423_v31 }
 0x186   :  { %626 = vmatmul.mubr.f32.gmra.mrb[10].mxu1 %v446_v32  ;;  %566 = vmatmul.mubr.f32.gmra.mrb[42].mxu0 %v422_v33 }
 0x187   :  { %630 = vmatprep.mubr.f32.mxu1 %v449_v34  ;;  %570 = vmatprep.mubr.f32.mxu0 %v425_v35 }
 0x18a   :  { %631 = vmatmul.mubr.f32.gmra.mrb[12].mxu1 %v448_v36  ;;  %571 = vmatmul.mubr.f32.gmra.mrb[44].mxu0 %v424_v37 }
 0x18b   :  { %635 = vmatprep.mubr.f32.mxu1 %v451_v38  ;;  %575 = vmatprep.mubr.f32.mxu0 %v427_v39 }
 0x18e   :  { %636 = vmatmul.mubr.f32.gmra.mrb[14].mxu1 %v450_v40  ;;  %576 = vmatmul.mubr.f32.gmra.mrb[46].mxu0 %v426_v41 }
 0x18f   :  { %640 = vmatprep.mubr.f32.mxu1 %v453_v42  ;;  %580 = vmatprep.mubr.f32.mxu0 %v429_v43 }
 0x192   :  { %641 = vmatmul.mubr.f32.gmra.mrb[16].mxu1 %v452_v44  ;;  %581 = vmatmul.mubr.f32.gmra.mrb[48].mxu0 %v428_v45 }
 0x193   :  { %645 = vmatprep.mubr.f32.mxu1 %v455_v46  ;;  %585 = vmatprep.mubr.f32.mxu0 %v431_v47 }
 0x196   :  { %646 = vmatmul.mubr.f32.gmra.mrb[18].mxu1 %v454_v48  ;;  %586 = vmatmul.mubr.f32.gmra.mrb[50].mxu0 %v430_v49 }
 0x197   :  { %650 = vmatprep.mubr.f32.mxu1 %v457_v50  ;;  %590 = vmatprep.mubr.f32.mxu0 %v433_v51 }
 0x19a   :  { %651 = vmatmul.mubr.f32.gmra.mrb[20].mxu1 %v456_v52  ;;  %591 = vmatmul.mubr.f32.gmra.mrb[52].mxu0 %v432_v53 }
 0x19b   :  { %655 = vmatprep.mubr.f32.mxu1 %v459_v54  ;;  %595 = vmatprep.mubr.f32.mxu0 %v435_v55 }
 0x19e   :  { %656 = vmatmul.mubr.f32.gmra.mrb[22].mxu1 %v458_v57  ;;  %596 = vmatmul.mubr.f32.gmra.mrb[54].mxu0 %v434_v58 }
 0x19f   :  { %660 = vmatprep.mubr.f32.mxu1 %v461_v60 }
 0x1a2   :  { %661 = vmatmul.mubr.f32.gmra.mrb[24].mxu1 %v460_v61 }
 0x1a3   :  { %665 = vmatprep.mubr.f32.mxu1 %v463_v62 }
 0x1a6   :  { %666 = vmatmul.mubr.f32.gmra.mrb[26].mxu1 %v462_v63 }
 0x1a7   :  { %670 = vmatprep.mubr.f32.mxu1 %v465_v0 }
 0x1aa   :  { %671 = vmatmul.mubr.f32.gmra.mrb[28].mxu1 %v464_v1 }
 0x1ab   :  { %675 = vmatprep.mubr.f32.mxu1 %v467_v2 }
 0x1ae   :  { %676 = vmatmul.mubr.f32.gmra.mrb[30].mxu1 %v466_v3 }
 0x1af   :  { %680 = vmatprep.mubr.f32.mxu1 %v469_v4 }
 0x1b2   :  { %681 = vmatmul.mubr.f32.gmra.mrb[32].mxu1 %v468_v5 }
 0x1b3   :  { %685 = vmatprep.mubr.f32.mxu1 %v471_v6 }
 0x1b6   :  { %686 = vmatmul.mubr.f32.gmra.mrb[34].mxu1 %v470_v7 }
 0x1b7   :  { %690 = vmatprep.mubr.f32.mxu1 %v473_v8 }
 0x1ba   :  { %691 = vmatmul.mubr.f32.gmra.mrb[36].mxu1 %v472_v9 }
 0x1bb   :  { %695 = vmatprep.mubr.f32.mxu1 %v475_v10 }
 0x1be   :  { %696 = vmatmul.mubr.f32.gmra.mrb[38].mxu1 %v474_v11 }
 0x245   :  { %v602_v13 = vpop.f32.mrb[0].mxu1  ;;  %v542_v15 = vpop.f32.mrb[32].mxu0 }
 0x246   :  { %v819_v16 = vadd.f32 %v1490_v12, %v602_v13  ;;  %v604_v17 = vpop.f32.mrb[1].mxu1  ;;  %v807_v18 = vadd.f32 %v1490_v12, %v542_v15  ;;  %v544_v19 = vpop.f32.mrb[33].mxu0 }
 0x248   :  { %vm852_vm0 = vcmp.ge.f32.partialorder %v819_v16, 0.0  ;;  %v885_v59 = vmul.f32 %v1495_v14, %v819_v16  ;;  %vm840_vm1 = vcmp.ge.f32.partialorder %v807_v18, 0.0  ;;  %v873_v20 = vmul.f32 %v1495_v14, %v807_v18 }
 0x249   :  { %v607_v21 = vpop.f32.mrb[2].mxu1  ;;  %v547_v56 = vpop.f32.mrb[34].mxu0 }
 0x24a   :  { %v917_v22 = vsel %vm852_vm0, %v819_v16, %v885_v59  ;;  %v820_v23 = vadd.f32 %v1490_v12, %v607_v21  ;;  %v609_v24 = vpop.f32.mrb[3].mxu1  ;;  %v905_v25 = vsel %vm840_vm1, %v807_v18, %v873_v20  ;;  %v808_v26 = vadd.f32 %v1490_v12, %v547_v56  ;;  %v549_v27 = vpop.f32.mrb[35].mxu0 }
 0x24b   :  { %949 = vst [vmem:[#allocation11 + $0x60] sm:$0xff] %v917_v22  ;;  %937 = vst [vmem:[#allocation11] sm:$0xff] %v905_v25 }
 0x24c   :  { %vm853_vm2 = vcmp.ge.f32.partialorder %v820_v23, 0.0  ;;  %v886_v28 = vmul.f32 %v1495_v14, %v820_v23  ;;  %vm841_vm3 = vcmp.ge.f32.partialorder %v808_v26, 0.0  ;;  %v874_v29 = vmul.f32 %v1495_v14, %v808_v26 }
 0x24d   :  { %v612_v30 = vpop.f32.mrb[4].mxu1  ;;  %v552_v31 = vpop.f32.mrb[36].mxu0 }
 0x24e   :  { %v918_v32 = vsel %vm853_vm2, %v820_v23, %v886_v28  ;;  %v821_v33 = vadd.f32 %v1490_v12, %v612_v30  ;;  %v614_v34 = vpop.f32.mrb[5].mxu1  ;;  %v906_v35 = vsel %vm841_vm3, %v808_v26, %v874_v29  ;;  %v809_v36 = vadd.f32 %v1490_v12, %v552_v31  ;;  %v554_v37 = vpop.f32.mrb[37].mxu0 }
 0x24f   :  { %950 = vst [vmem:[#allocation11 + $0x68] sm:$0xff] %v918_v32  ;;  %938 = vst [vmem:[#allocation11 + $0x8] sm:$0xff] %v906_v35 }
 0x250   :  { %vm854_vm4 = vcmp.ge.f32.partialorder %v821_v33, 0.0  ;;  %v887_v38 = vmul.f32 %v1495_v14, %v821_v33  ;;  %vm842_vm5 = vcmp.ge.f32.partialorder %v809_v36, 0.0  ;;  %v875_v39 = vmul.f32 %v1495_v14, %v809_v36 }
 0x251   :  { %v617_v40 = vpop.f32.mrb[6].mxu1  ;;  %v557_v41 = vpop.f32.mrb[38].mxu0 }
 0x252   :  { %v919_v42 = vsel %vm854_vm4, %v821_v33, %v887_v38  ;;  %v822_v43 = vadd.f32 %v1490_v12, %v617_v40  ;;  %v619_v44 = vpop.f32.mrb[7].mxu1  ;;  %v907_v45 = vsel %vm842_vm5, %v809_v36, %v875_v39  ;;  %v810_v46 = vadd.f32 %v1490_v12, %v557_v41  ;;  %v559_v47 = vpop.f32.mrb[39].mxu0 }
 0x253   :  { %951 = vst [vmem:[#allocation11 + $0x70] sm:$0xff] %v919_v42  ;;  %939 = vst [vmem:[#allocation11 + $0x10] sm:$0xff] %v907_v45 }
 0x254   :  { %vm855_vm6 = vcmp.ge.f32.partialorder %v822_v43, 0.0  ;;  %v888_v48 = vmul.f32 %v1495_v14, %v822_v43  ;;  %vm843_vm7 = vcmp.ge.f32.partialorder %v810_v46, 0.0  ;;  %v876_v49 = vmul.f32 %v1495_v14, %v810_v46 }
 0x255   :  { %v622_v50 = vpop.f32.mrb[8].mxu1  ;;  %v562_v51 = vpop.f32.mrb[40].mxu0 }
 0x256   :  { %v920_v52 = vsel %vm855_vm6, %v822_v43, %v888_v48  ;;  %v823_v53 = vadd.f32 %v1490_v12, %v622_v50  ;;  %v624_v54 = vpop.f32.mrb[9].mxu1  ;;  %v908_v55 = vsel %vm843_vm7, %v810_v46, %v876_v49  ;;  %v811_v57 = vadd.f32 %v1490_v12, %v562_v51  ;;  %v564_v58 = vpop.f32.mrb[41].mxu0 }
 0x257   :  { %952 = vst [vmem:[#allocation11 + $0x78] sm:$0xff] %v920_v52  ;;  %940 = vst [vmem:[#allocation11 + $0x18] sm:$0xff] %v908_v55 }
 0x258   :  { %vm856_vm8 = vcmp.ge.f32.partialorder %v823_v53, 0.0  ;;  %v889_v60 = vmul.f32 %v1495_v14, %v823_v53  ;;  %vm844_vm9 = vcmp.ge.f32.partialorder %v811_v57, 0.0  ;;  %v877_v61 = vmul.f32 %v1495_v14, %v811_v57 }
 0x259   :  { %v627_v62 = vpop.f32.mrb[10].mxu1  ;;  %v567_v63 = vpop.f32.mrb[42].mxu0 }
 0x25a   :  { %v921_v0 = vsel %vm856_vm8, %v823_v53, %v889_v60  ;;  %v824_v1 = vadd.f32 %v1490_v12, %v627_v62  ;;  %v629_v2 = vpop.f32.mrb[11].mxu1  ;;  %v909_v3 = vsel %vm844_vm9, %v811_v57, %v877_v61  ;;  %v812_v4 = vadd.f32 %v1490_v12, %v567_v63  ;;  %v569_v5 = vpop.f32.mrb[43].mxu0 }
 0x25b   :  { %953 = vst [vmem:[#allocation11 + $0x80] sm:$0xff] %v921_v0  ;;  %941 = vst [vmem:[#allocation11 + $0x20] sm:$0xff] %v909_v3 }
 0x25c   :  { %vm857_vm10 = vcmp.ge.f32.partialorder %v824_v1, 0.0  ;;  %v890_v6 = vmul.f32 %v1495_v14, %v824_v1  ;;  %vm845_vm11 = vcmp.ge.f32.partialorder %v812_v4, 0.0  ;;  %v878_v7 = vmul.f32 %v1495_v14, %v812_v4 }
 0x25d   :  { %v632_v8 = vpop.f32.mrb[12].mxu1  ;;  %v572_v9 = vpop.f32.mrb[44].mxu0 }
 0x25e   :  { %v922_v10 = vsel %vm857_vm10, %v824_v1, %v890_v6  ;;  %v825_v11 = vadd.f32 %v1490_v12, %v632_v8  ;;  %v634_v13 = vpop.f32.mrb[13].mxu1  ;;  %v910_v15 = vsel %vm845_vm11, %v812_v4, %v878_v7  ;;  %v813_v16 = vadd.f32 %v1490_v12, %v572_v9  ;;  %v574_v17 = vpop.f32.mrb[45].mxu0 }
 0x25f   :  { %954 = vst [vmem:[#allocation11 + $0x88] sm:$0xff] %v922_v10  ;;  %942 = vst [vmem:[#allocation11 + $0x28] sm:$0xff] %v910_v15 }
 0x260   :  { %vm858_vm12 = vcmp.ge.f32.partialorder %v825_v11, 0.0  ;;  %v891_v18 = vmul.f32 %v1495_v14, %v825_v11  ;;  %vm846_vm13 = vcmp.ge.f32.partialorder %v813_v16, 0.0  ;;  %v879_v19 = vmul.f32 %v1495_v14, %v813_v16 }
 0x261   :  { %v637_v59 = vpop.f32.mrb[14].mxu1  ;;  %v577_v20 = vpop.f32.mrb[46].mxu0 }
 0x262   :  { %v923_v21 = vsel %vm858_vm12, %v825_v11, %v891_v18  ;;  %v826_v56 = vadd.f32 %v1490_v12, %v637_v59  ;;  %v639_v22 = vpop.f32.mrb[15].mxu1  ;;  %v911_v23 = vsel %vm846_vm13, %v813_v16, %v879_v19  ;;  %v814_v24 = vadd.f32 %v1490_v12, %v577_v20  ;;  %v579_v25 = vpop.f32.mrb[47].mxu0 }
 0x263   :  { %955 = vst [vmem:[#allocation11 + $0x90] sm:$0xff] %v923_v21  ;;  %943 = vst [vmem:[#allocation11 + $0x30] sm:$0xff] %v911_v23 }
 0x264   :  { %vm859_vm14 = vcmp.ge.f32.partialorder %v826_v56, 0.0  ;;  %v892_v26 = vmul.f32 %v1495_v14, %v826_v56  ;;  %vm847_vm15 = vcmp.ge.f32.partialorder %v814_v24, 0.0  ;;  %v880_v27 = vmul.f32 %v1495_v14, %v814_v24 }
 0x265   :  { %v642_v28 = vpop.f32.mrb[16].mxu1  ;;  %v582_v29 = vpop.f32.mrb[48].mxu0 }
 0x266   :  { %v924_v30 = vsel %vm859_vm14, %v826_v56, %v892_v26  ;;  %v827_v31 = vadd.f32 %v1490_v12, %v642_v28  ;;  %v644_v32 = vpop.f32.mrb[17].mxu1  ;;  %v912_v33 = vsel %vm847_vm15, %v814_v24, %v880_v27  ;;  %v815_v34 = vadd.f32 %v1490_v12, %v582_v29  ;;  %v584_v35 = vpop.f32.mrb[49].mxu0 }
 0x267   :  { %956 = vst [vmem:[#allocation11 + $0x98] sm:$0xff] %v924_v30  ;;  %944 = vst [vmem:[#allocation11 + $0x38] sm:$0xff] %v912_v33 }
 0x268   :  { %vm860_vm0 = vcmp.ge.f32.partialorder %v827_v31, 0.0  ;;  %v893_v36 = vmul.f32 %v1495_v14, %v827_v31  ;;  %vm848_vm1 = vcmp.ge.f32.partialorder %v815_v34, 0.0  ;;  %v881_v37 = vmul.f32 %v1495_v14, %v815_v34 }
 0x269   :  { %v647_v38 = vpop.f32.mrb[18].mxu1  ;;  %v587_v39 = vpop.f32.mrb[50].mxu0 }
 0x26a   :  { %v925_v40 = vsel %vm860_vm0, %v827_v31, %v893_v36  ;;  %v828_v41 = vadd.f32 %v1490_v12, %v647_v38  ;;  %v649_v42 = vpop.f32.mrb[19].mxu1  ;;  %v913_v43 = vsel %vm848_vm1, %v815_v34, %v881_v37  ;;  %v816_v44 = vadd.f32 %v1490_v12, %v587_v39  ;;  %v589_v45 = vpop.f32.mrb[51].mxu0 }
 0x26b   :  { %957 = vst [vmem:[#allocation11 + $0xa0] sm:$0xff] %v925_v40  ;;  %945 = vst [vmem:[#allocation11 + $0x40] sm:$0xff] %v913_v43 }
 0x26c   :  { %vm861_vm2 = vcmp.ge.f32.partialorder %v828_v41, 0.0  ;;  %v894_v46 = vmul.f32 %v1495_v14, %v828_v41  ;;  %vm849_vm3 = vcmp.ge.f32.partialorder %v816_v44, 0.0  ;;  %v882_v47 = vmul.f32 %v1495_v14, %v816_v44 }
 0x26d   :  { %v652_v48 = vpop.f32.mrb[20].mxu1  ;;  %v592_v49 = vpop.f32.mrb[52].mxu0 }
 0x26e   :  { %v926_v50 = vsel %vm861_vm2, %v828_v41, %v894_v46  ;;  %v829_v51 = vadd.f32 %v1490_v12, %v652_v48  ;;  %v654_v52 = vpop.f32.mrb[21].mxu1  ;;  %v914_v53 = vsel %vm849_vm3, %v816_v44, %v882_v47  ;;  %v817_v54 = vadd.f32 %v1490_v12, %v592_v49  ;;  %v594_v55 = vpop.f32.mrb[53].mxu0 }
 0x26f   :  { %958 = vst [vmem:[#allocation11 + $0xa8] sm:$0xff] %v926_v50  ;;  %946 = vst [vmem:[#allocation11 + $0x48] sm:$0xff] %v914_v53 }
 0x270   :  { %vm862_vm4 = vcmp.ge.f32.partialorder %v829_v51, 0.0  ;;  %v895_v57 = vmul.f32 %v1495_v14, %v829_v51  ;;  %vm850_vm5 = vcmp.ge.f32.partialorder %v817_v54, 0.0  ;;  %v883_v58 = vmul.f32 %v1495_v14, %v817_v54 }
 0x271   :  { %v657_v60 = vpop.f32.mrb[22].mxu1  ;;  %v597_v61 = vpop.f32.mrb[54].mxu0 }
 0x272   :  { %v927_v62 = vsel %vm862_vm4, %v829_v51, %v895_v57  ;;  %v830_v63 = vadd.f32 %v1490_v12, %v657_v60  ;;  %v659_v0 = vpop.f32.mrb[23].mxu1  ;;  %v915_v1 = vsel %vm850_vm5, %v817_v54, %v883_v58  ;;  %v818_v2 = vadd.f32 %v1490_v12, %v597_v61  ;;  %v599_v3 = vpop.f32.mrb[55].mxu0 }
 0x273   :  { %959 = vst [vmem:[#allocation11 + $0xb0] sm:$0xff] %v927_v62  ;;  %947 = vst [vmem:[#allocation11 + $0x50] sm:$0xff] %v915_v1 }
 0x274   :  { %vm863_vm6 = vcmp.ge.f32.partialorder %v830_v63, 0.0  ;;  %v896_v4 = vmul.f32 %v1495_v14, %v830_v63  ;;  %vm851_vm7 = vcmp.ge.f32.partialorder %v818_v2, 0.0  ;;  %v884_v5 = vmul.f32 %v1495_v14, %v818_v2 }
 0x275   :  { %v662_v6 = vpop.f32.mrb[24].mxu1 }
 0x276   :  { %v928_v7 = vsel %vm863_vm6, %v830_v63, %v896_v4  ;;  %v831_v8 = vadd.f32 %v1490_v12, %v662_v6  ;;  %v664_v9 = vpop.f32.mrb[25].mxu1  ;;  %v916_v10 = vsel %vm851_vm7, %v818_v2, %v884_v5 }
 0x277   :  { %960 = vst [vmem:[#allocation11 + $0xb8] sm:$0xff] %v928_v7  ;;  %948 = vst [vmem:[#allocation11 + $0x58] sm:$0xff] %v916_v10 }
 0x278   :  { %vm864_vm8 = vcmp.ge.f32.partialorder %v831_v8, 0.0  ;;  %v897_v11 = vmul.f32 %v1495_v14, %v831_v8 }
 0x279   :  { %v667_v13 = vpop.f32.mrb[26].mxu1 }
 0x27a   :  { %v929_v15 = vsel %vm864_vm8, %v831_v8, %v897_v11  ;;  %v832_v16 = vadd.f32 %v1490_v12, %v667_v13  ;;  %v669_v17 = vpop.f32.mrb[27].mxu1 }
 0x27b   :  { %961 = vst [vmem:[#allocation11 + $0xc0] sm:$0xff] %v929_v15 }
 0x27c   :  { %vm865_vm9 = vcmp.ge.f32.partialorder %v832_v16, 0.0  ;;  %v898_v18 = vmul.f32 %v1495_v14, %v832_v16 }
 0x27d   :  { %v672_v19 = vpop.f32.mrb[28].mxu1 }
 0x27e   :  { %v930_v59 = vsel %vm865_vm9, %v832_v16, %v898_v18  ;;  %v833_v20 = vadd.f32 %v1490_v12, %v672_v19  ;;  %v674_v21 = vpop.f32.mrb[29].mxu1 }
 0x27f   :  { %962 = vst [vmem:[#allocation11 + $0xc8] sm:$0xff] %v930_v59 }
 0x280   :  { %vm866_vm10 = vcmp.ge.f32.partialorder %v833_v20, 0.0  ;;  %v899_v56 = vmul.f32 %v1495_v14, %v833_v20 }
 0x281   :  { %v677_v22 = vpop.f32.mrb[30].mxu1 }
 0x282   :  { %v931_v23 = vsel %vm866_vm10, %v833_v20, %v899_v56  ;;  %v834_v24 = vadd.f32 %v1490_v12, %v677_v22  ;;  %v679_v25 = vpop.f32.mrb[31].mxu1 }
 0x283   :  { %963 = vst [vmem:[#allocation11 + $0xd0] sm:$0xff] %v931_v23 }
 0x284   :  { %vm867_vm11 = vcmp.ge.f32.partialorder %v834_v24, 0.0  ;;  %v900_v26 = vmul.f32 %v1495_v14, %v834_v24 }
 0x285   :  { %v682_v27 = vpop.f32.mrb[32].mxu1 }
 0x286   :  { %v932_v28 = vsel %vm867_vm11, %v834_v24, %v900_v26  ;;  %v835_v29 = vadd.f32 %v1490_v12, %v682_v27  ;;  %v684_v30 = vpop.f32.mrb[33].mxu1 }
 0x287   :  { %964 = vst [vmem:[#allocation11 + $0xd8] sm:$0xff] %v932_v28 }
 0x288   :  { %vm868_vm12 = vcmp.ge.f32.partialorder %v835_v29, 0.0  ;;  %v901_v31 = vmul.f32 %v1495_v14, %v835_v29 }
 0x289   :  { %v687_v32 = vpop.f32.mrb[34].mxu1 }
 0x28a   :  { %v933_v33 = vsel %vm868_vm12, %v835_v29, %v901_v31  ;;  %v836_v34 = vadd.f32 %v1490_v12, %v687_v32  ;;  %v689_v35 = vpop.f32.mrb[35].mxu1 }
 0x28b   :  { %965 = vst [vmem:[#allocation11 + $0xe0] sm:$0xff] %v933_v33 }
 0x28c   :  { %vm869_vm13 = vcmp.ge.f32.partialorder %v836_v34, 0.0  ;;  %v902_v36 = vmul.f32 %v1495_v14, %v836_v34 }
 0x28d   :  { %v692_v37 = vpop.f32.mrb[36].mxu1 }
 0x28e   :  { %v934_v38 = vsel %vm869_vm13, %v836_v34, %v902_v36  ;;  %v837_v39 = vadd.f32 %v1490_v12, %v692_v37  ;;  %v694_v40 = vpop.f32.mrb[37].mxu1 }
 0x28f   :  { %966 = vst [vmem:[#allocation11 + $0xe8] sm:$0xff] %v934_v38 }
 0x290   :  { %vm870_vm14 = vcmp.ge.f32.partialorder %v837_v39, 0.0  ;;  %v903_v41 = vmul.f32 %v1495_v14, %v837_v39 }
 0x291   :  { %v697_v42 = vpop.f32.mrb[38].mxu1 }
 0x292   :  { %v935_v43 = vsel %vm870_vm14, %v837_v39, %v903_v41  ;;  %v838_v44 = vadd.f32 %v1490_v12, %v697_v42  ;;  %v699_v45 = vpop.f32.mrb[39].mxu1 }
 0x293   :  { %967 = vst [vmem:[#allocation11 + $0xf0] sm:$0xff] %v935_v43 }
 0x294   :  { %vm871_vm15 = vcmp.ge.f32.partialorder %v838_v44, 0.0  ;;  %v904_v46 = vmul.f32 %v1495_v14, %v838_v44 }
 0x296   :  { %v936_v47 = vsel %vm871_vm15, %v838_v44, %v904_v46 }
 0x297   :  { %968 = vst [vmem:[#allocation11 + $0xf8] sm:$0xff] %v936_v47 }
 0x298   :  { %1315 = shalt.err (!%p1312_p0)
}
 0x299   :  { %s1316_s18 = scalar_lea.hbm %s1582_s6, 4096 }
 0x29a   :  { %p1317_p1 = scmp.ne.s32.totalorder %s1582_s6, %s1316_s18  ;;  %p1320_p2 = scmp.lt.u32.totalorder %s1316_s18, %s1582_s6 }
 0x29c   :  { %p1322_p3 = pnand %p1320_p2, %p1317_p1 }
 0x29e   :  { %1325 = shalt.err (!%p1322_p3)
}
 0x29f   :  { %980 = dma.vmem_to_hbm [thread:$0]  %s975_s5, 4096, %s1582_s6, [#allocation7], %s1336_s2, %s1336_s2, %s1337_s21  }
 0x2a0   :  { %1330 = dma.done.wait [#allocation7], 4096  }
 0x2a1   :  { %1331 = vsyncadd [#allocation7], 4294963200 }
 0x2a2   :  { %984 = vsyncpa [#allocation6], 1 }
 0x2a3   :  { %985 = vsyncpa [#allocation9], 1 }
 0x2a4   :  { %986 = vsyncpa [#allocation7], 1 }

</bundles_post_ra>
